<compile_context>
chip_gen: v7x
topology: tpu7x:2x2x1
jax: 0.10.0
libtpu: 0.0.40
codegen_flags: <defaults>
</compile_context>

<pallas_src>
import functools
import math

import numpy as np
import jax
import jax.numpy as jnp
from jax.experimental import pallas as pl
from jax.experimental.pallas import tpu as pltpu


# ---------------------------------------------------------------------------
# kernel 1: sampled-score sparsity measure  M = max_s(Q K_s^T) - sum_s(.)/L_K
# ---------------------------------------------------------------------------
def _sample_score_kernel(q_ref, ks_ref, m_ref, *, L_K):
    # q_ref: (T_H, L_Q, D)   ks_ref: (T_H, S, D)   m_ref: (1, T_H, L_Q)
    q = q_ref[...]
    ks = ks_ref[...]
    s = jnp.einsum("hqd,hsd->hqs", q, ks,
                   preferred_element_type=jnp.float32)       # (T_H, L_Q, S)
    # lane-dense M: L_Q in the minor (lane) dimension
    m_ref[0] = jnp.max(s, axis=-1) - jnp.sum(s, axis=-1) * (1.0 / L_K)


# ---------------------------------------------------------------------------
# kernel 2: top-k attention, ProbMask, head-folded initial context, scatter
# ---------------------------------------------------------------------------
def _prob_attn_kernel(q_ref, k_ref, vf_ref, idx_ref, ctx_ref, *,
                      scale, mask_flag, matmul_dtype):
    # q_ref: (T_H, L_Q, D)      k_ref: (T_H, L_K, D)
    # vf_ref: (1, L_K, T_H*D)   head-folded V (original (B, L, H, D) layout)
    # idx_ref: (1, T_H, u)      int32 top-k query positions
    # ctx_ref: (1, L_Q, T_H*D)  lane-dense output slab (== final layout)
    f32 = jnp.float32
    q = q_ref[...]
    k = k_ref[...]
    vf = vf_ref[0]                                 # (L_K, T_H*D)
    idx = idx_ref[0]                               # (T_H, u)
    T_H, L_Q, D = q.shape
    L_K = k.shape[1]
    u = idx.shape[-1]

    # one-hot selector over query positions: sel[h, l, i] = (l == idx[h, i])
    lpos = jax.lax.broadcasted_iota(jnp.int32, (T_H, L_Q, u), 1)
    sel = (lpos == idx[:, None, :]).astype(f32)    # (T_H, L_Q, u)
    sel_md = sel.astype(matmul_dtype)

    # gather Q_reduce = Q[idx] on the MXU (0/1 x value -> exact in f32 accum)
    q_red = jnp.einsum("hlu,hld->hud", sel_md, q,
                       preferred_element_type=f32)             # (T_H, u, D)

    # scores = Q_reduce . K^T ; scale applied in f32 AFTER the matmul so the
    # gathered values round-trip the matmul_dtype cast losslessly.
    scores = jnp.einsum("hud,hkd->huk", q_red.astype(matmul_dtype), k,
                        preferred_element_type=f32) * scale    # (T_H, u, L_K)

    if mask_flag:
        # ProbMask: mask keys strictly past the selected query position.  The
        # positions are recovered in (u, 1) orientation with a tiny one-hot
        # matmul kept in f32 (positions must be exact; do NOT cast to bf16).
        lcol = jax.lax.broadcasted_iota(f32, (T_H, L_Q, 1), 1)
        sel_pos = jnp.round(jnp.einsum("hlu,hlc->huc", sel, lcol,
                                       preferred_element_type=f32))
        sel_pos = sel_pos.astype(jnp.int32)                    # (T_H, u, 1)
        kpos = jax.lax.broadcasted_iota(jnp.int32, (T_H, u, L_K), 2)
        scores = jnp.where(kpos > sel_pos, -jnp.inf, scores)

    # softmax pieces; normalization deferred to after the PV matmul (EUP recip)
    smax = jnp.max(scores, axis=-1, keepdims=True)
    p = jnp.exp(scores - smax)
    denom = jnp.sum(p, axis=-1, keepdims=True)                 # (T_H, u, 1)
    # TODO(synk): nn.Dropout(attention_dropout) on the attention probabilities
    # is omitted (inference / eval behavior = identity).

    # initial context, head-folded: ONE 128-lane-wide MXU matmul (dominant op)
    if mask_flag:
        r = jax.lax.broadcasted_iota(jnp.int32, (L_Q, L_K), 0)
        c = jax.lax.broadcasted_iota(jnp.int32, (L_Q, L_K), 1)
        tri = (r >= c).astype(matmul_dtype)                    # built in-kernel
        ctx0 = jnp.dot(tri, vf, preferred_element_type=f32)    # cumsum(V) folded
    else:
        vmean = jnp.mean(vf.astype(f32), axis=0, keepdims=True)
        ctx0 = jnp.broadcast_to(vmean, (L_Q, T_H * D))

    # per-head PV matmul + in-register scatter via the one-hot selector
    scat_pieces, mask_pieces = [], []
    for h in range(T_H):                           # static unroll, T_H small
        v_h = vf[:, h * D:(h + 1) * D]                            # (L_K, D)
        upd_h = jnp.dot(p[h].astype(matmul_dtype), v_h,
                        preferred_element_type=f32)               # (u, D)
        upd_h = upd_h * pl.reciprocal(denom[h], approx=True)
        scat_pieces.append(jnp.dot(sel[h], upd_h,
                                   preferred_element_type=f32))   # (L_Q, D)
        mask_pieces.append(jnp.broadcast_to(
            jnp.sum(sel[h], axis=-1, keepdims=True), (L_Q, D)))
    scat = jnp.concatenate(scat_pieces, axis=-1)                  # (L_Q, T_H*D)
    rowmask = jnp.concatenate(mask_pieces, axis=-1)               # (L_Q, T_H*D)

    # single lane-dense store in the final (B, L_Q, H*D) layout
    ctx_ref[0] = jnp.where(rowmask > 0, scat, ctx0)


# ---------------------------------------------------------------------------
# head-tile selection
# ---------------------------------------------------------------------------
def _choose_head_tile(B, H, D, est_bytes, budget):
    """Pick T_H | H.  Hard-prefer lane-dense / legal folds (T_H*D % 128 == 0 or
    T_H == H), then >=2 grid steps (TC sharding), then even step count (v7x
    2-TC balance), then the largest tile that fits the VMEM budget."""
    divisors = [d for d in range(1, H + 1) if H % d == 0]
    legal = [d for d in divisors if (d * D) % 128 == 0 or d == H]
    fitting = [d for d in legal if est_bytes(d) <= budget]
    if not fitting:
        return min(legal)                      # best effort; may spill

    def score(d):
        g = B * (H // d)
        return ((d * D) % 128 == 0, g >= 2, g % 2 == 0, d)

    return max(fitting, key=score)


# ---------------------------------------------------------------------------
# wrapper
# ---------------------------------------------------------------------------
def prob_attention(queries, keys, values, *, factor=5, scale=None, mask_flag=True,
                   matmul_dtype=jnp.bfloat16):
    """queries/keys/values: (B, L, H, D).  Returns (context (B, L_Q, H, D), None).

    matmul_dtype controls the storage/operand dtype of Q/K/V (accumulation and
    softmax math are always f32).  Use jnp.float32 for bit-closest reference
    numerics; bf16 can reorder near-tie sparsity scores in the top-k.
    """
    B, L_Q, H, D = queries.shape
    _, L_K, _, _ = keys.shape

    if mask_flag:
        # reference asserts L_Q == L_V for the cumulative-sum initial context
        assert L_Q == L_K, "mask_flag=True requires L_Q == L_K (as in reference)"

    # ---- ProbSparse sizes (same arithmetic as the reference) ----
    U_part = factor * int(np.ceil(np.log(max(L_K, 1.1))))
    u = factor * int(np.ceil(np.log(max(L_Q, 1.1))))
    U_part = max(1, U_part)
    u = max(1, u)
    U_part = U_part if U_part < L_K else L_K
    u = u if u < L_Q else L_Q

    sample_k = max(1, U_part)
    if L_K < sample_k:
        sample_k = L_K
    step = L_K // sample_k

    md = matmul_dtype
    md_bytes = int(jnp.dtype(md).itemsize)

    # head-major Q/K (transpose fused with the downcast: one HBM pass each);
    # V and the output stay in the original head-folded layout (no transpose).
    Q_hm = jnp.transpose(queries, (0, 2, 1, 3)).reshape(B * H, L_Q, D).astype(md)
    K_hm = jnp.transpose(keys, (0, 2, 1, 3)).reshape(B * H, L_K, D).astype(md)
    V_fold = values.reshape(B, L_K, H * D).astype(md)

    # kernel 1 only ever sees the sampled keys
    K_samp = K_hm if step == 1 else K_hm[:, ::step, :]
    S = int(K_samp.shape[1])

    # ---- chip-derived VMEM budget / limit ----
    try:
        vmem_cap = int(pltpu.get_tpu_info().vmem_capacity_bytes)
    except Exception:
        vmem_cap = 64 * 1024 * 1024            # safe lower bound (v7x per-TC)
    vmem_limit = min(int(vmem_cap * 0.75), 112 * 1024 * 1024)

    def est_vmem(t):
        # double-buffered DMA blocks (kernel 2 dominates) + in-kernel temps
        blocks = 2 * md_bytes * (t * L_Q * D + t * L_K * D + L_K * t * D) \
               + 2 * 4 * (L_Q * t * D) + 2 * 4 * t * max(u, 128)
        temps = 4 * (t * L_Q * S + 2 * t * u * L_K + t * L_Q * u
                     + 3 * L_Q * t * D) + md_bytes * L_Q * L_K
        return blocks + temps

    T_H = _choose_head_tile(B, H, D, est_vmem, int(vmem_limit * 0.8))
    HpT = H // T_H
    grid = (B, HpT)

    # ---- kernel 1: sparsity measure M over the sampled keys ----
    k1_cost = pl.CostEstimate(
        flops=int(2 * B * H * L_Q * S * D),
        transcendentals=0,
        bytes_accessed=int(md_bytes * B * H * (L_Q * D + S * D) + 4 * B * H * L_Q))
    m_out = pl.pallas_call(
        functools.partial(_sample_score_kernel, L_K=L_K),
        out_shape=jax.ShapeDtypeStruct((B * HpT, T_H, L_Q), jnp.float32),
        grid=grid,
        in_specs=[pl.BlockSpec((T_H, L_Q, D), lambda b, t: (b * HpT + t, 0, 0)),
                  pl.BlockSpec((T_H, S, D), lambda b, t: (b * HpT + t, 0, 0))],
        out_specs=pl.BlockSpec((1, T_H, L_Q), lambda b, t: (b * HpT + t, 0, 0)),
        compiler_params=pltpu.CompilerParams(
            dimension_semantics=("parallel", "parallel"),
            vmem_limit_bytes=vmem_limit),
        cost_estimate=k1_cost,
    )(Q_hm, K_samp)
    M = m_out.reshape(B, H, L_Q)

    # top-k query selection (data-dependent) stays in XLA; indices go back in
    # as an int32 block so kernel 2 gathers/scatters on-chip.
    _, M_top = jax.lax.top_k(M, u)                           # (B, H, u)
    idx_in = M_top.astype(jnp.int32).reshape(B * HpT, T_H, u)

    scale_ = scale if scale is not None else 1.0 / math.sqrt(D)

    # ---- kernel 2: top-k attention + folded initial context + scatter ----
    k2_flops = 2 * B * H * (2 * u * L_Q * D + 2 * u * L_K * D)
    if mask_flag:
        k2_flops += 2 * B * L_Q * L_K * H * D + 2 * B * H * u * L_Q
    k2_cost = pl.CostEstimate(
        flops=int(k2_flops),
        transcendentals=int(B * H * u * (L_K + 1)),
        bytes_accessed=int(md_bytes * B * H * (L_Q * D + 2 * L_K * D)
                           + 4 * B * (H * u + L_Q * H * D)))
    ctx_fold = pl.pallas_call(
        functools.partial(_prob_attn_kernel, scale=scale_, mask_flag=mask_flag,
                          matmul_dtype=md),
        out_shape=jax.ShapeDtypeStruct((B, L_Q, H * D), jnp.float32),
        grid=grid,
        in_specs=[pl.BlockSpec((T_H, L_Q, D), lambda b, t: (b * HpT + t, 0, 0)),
                  pl.BlockSpec((T_H, L_K, D), lambda b, t: (b * HpT + t, 0, 0)),
                  pl.BlockSpec((1, L_K, T_H * D), lambda b, t: (b, 0, t)),
                  pl.BlockSpec((1, T_H, u), lambda b, t: (b * HpT + t, 0, 0))],
        out_specs=pl.BlockSpec((1, L_Q, T_H * D), lambda b, t: (b, 0, t)),
        compiler_params=pltpu.CompilerParams(
            dimension_semantics=("parallel", "parallel"),
            vmem_limit_bytes=vmem_limit),
        cost_estimate=k2_cost,
    )(Q_hm, K_hm, V_fold, idx_in)

    # the folded slab already IS the (B, L_Q, H, D) output layout: free reshape
    context = ctx_fold.reshape(B, L_Q, H, D)
    return context, None


# ---------------------------------------------------------------------------
# pure-JAX reference (mirrors the PyTorch module) for a correctness check
# ---------------------------------------------------------------------------
def _prob_attention_reference(queries, keys, values, *, factor=5, scale=None,
                              mask_flag=True):
    B, L_Q, H, D = queries.shape
    _, L_K, _, _ = keys.shape
    Q = jnp.transpose(queries, (0, 2, 1, 3)).astype(jnp.float32)
    K = jnp.transpose(keys, (0, 2, 1, 3)).astype(jnp.float32)
    V = jnp.transpose(values, (0, 2, 1, 3)).astype(jnp.float32)

    U_part = factor * int(np.ceil(np.log(max(L_K, 1.1))))
    u = factor * int(np.ceil(np.log(max(L_Q, 1.1))))
    U_part = max(1, U_part)
    u = max(1, u)
    U_part = U_part if U_part < L_K else L_K
    u = u if u < L_Q else L_Q

    sample_k = max(1, U_part)
    if L_K < sample_k:
        sample_k = L_K
    step = L_K // sample_k
    index_sample = np.arange(0, L_K, step)
    K_sample = K[:, :, index_sample, :]
    QKs = jnp.einsum("bhqd,bhsd->bhqs", Q, K_sample)
    M = jnp.max(QKs, axis=-1) - jnp.sum(QKs, axis=-1) / L_K
    _, M_top = jax.lax.top_k(M, u)

    b_idx = jnp.arange(B)[:, None, None]
    h_idx = jnp.arange(H)[None, :, None]
    Q_reduce = Q[b_idx, h_idx, M_top]
    scale_ = scale if scale is not None else 1.0 / math.sqrt(D)
    scores = jnp.einsum("bhud,bhkd->bhuk", Q_reduce, K) * scale_
    if mask_flag:
        kpos = jnp.arange(L_K)[None, None, None, :]
        scores = jnp.where(kpos > M_top[..., None], -jnp.inf, scores)
        ctx = jnp.cumsum(V, axis=-2)
    else:
        ctx = jnp.broadcast_to(jnp.mean(V, axis=-2, keepdims=True),
                               (B, H, L_Q, D))
    attn = jax.nn.softmax(scores, axis=-1)
    upd = jnp.einsum("bhuk,bhkd->bhud", attn, V)
    ctx = ctx.at[b_idx, h_idx, M_top].set(upd)
    return jnp.transpose(ctx, (0, 2, 1, 3))


if __name__ == "__main__":
    B, L, H, D = 2, 16, 4, 32
    key = jax.random.PRNGKey(0)
    kq, kk, kv = jax.random.split(key, 3)

    def mk(k):
        x = jax.random.normal(k, (B, L, H, D), dtype=jnp.float32)
        # bf16-representable test inputs so the default bf16 kernel is directly
        # comparable to the f32 reference (kernel accumulations are f32).
        return x.astype(jnp.bfloat16).astype(jnp.float32)

    queries = mk(kq)
    keys_ = mk(kk)
    values = mk(kv)

    context, attn = prob_attention(queries, keys_, values,
                                   factor=5, scale=None, mask_flag=True)
    context = jax.block_until_ready(context)

    assert context.shape == (B, L, H, D)
    assert bool(jnp.all(jnp.isfinite(context)))

    ref = _prob_attention_reference(queries, keys_, values,
                                    factor=5, scale=None, mask_flag=True)
    max_err = float(jnp.max(jnp.abs(context - ref)))
    assert max_err < 2e-2, f"max abs error vs reference: {max_err}"
    print("KERNEL_OK")
</pallas_src>

<mosaic_0001>
module attributes {stable_mosaic.version = 11 : i64} {
  func.func @_sample_score_kernel(%arg0: i32, %arg1: i32, %arg2: memref<4x16x32xbf16, #tpu.memory_space<vmem>>, %arg3: memref<4x16x32xbf16, #tpu.memory_space<vmem>>, %arg4: memref<1x4x16xf32, #tpu.memory_space<vmem>>) attributes {dimension_semantics = [#tpu.dimension_semantics<parallel>, #tpu.dimension_semantics<parallel>], iteration_bounds = array<i64: 2, 1>, scalar_prefetch = 0 : i64, scratch_operands = 0 : i64, tpu.core_type = #tpu.core_type<tc>, window_params = [{transform_indices = @transform_0, window_bounds = array<i64: 4, 16, 32>}, {transform_indices = @transform_1, window_bounds = array<i64: 4, 16, 32>}, {transform_indices = @transform_2, window_bounds = array<i64: 1, 4, 16>}]} {
    %c0 = arith.constant 0 : index
    %c0_0 = arith.constant 0 : index
    %c0_1 = arith.constant 0 : index
    %0 = vector.load %arg2[%c0, %c0_0, %c0_1] : memref<4x16x32xbf16, #tpu.memory_space<vmem>>, vector<4x16x32xbf16>
    %c0_2 = arith.constant 0 : index
    %c0_3 = arith.constant 0 : index
    %c0_4 = arith.constant 0 : index
    %1 = vector.load %arg3[%c0_2, %c0_3, %c0_4] : memref<4x16x32xbf16, #tpu.memory_space<vmem>>, vector<4x16x32xbf16>
    "tpu.trace_start"() <{level = 10 : i32, message = "hqd,hsd->hqs"}> : () -> ()
    %cst = arith.constant dense<0.000000e+00> : vector<4x16x16xf32>
    %2 = tpu.matmul %0, %1, %cst {dimension_numbers = #tpu.dot_dimension_numbers<[2], [2], [1], [1], [0, 0, 0, 1, 1, 1], [0], [0]>} : vector<4x16x32xbf16>, vector<4x16x32xbf16>, vector<4x16x16xf32> -> vector<4x16x16xf32>
    "tpu.trace_stop"() : () -> ()
    %cst_5 = arith.constant dense<0xFF800000> : vector<4x16xf32>
    %3 = vector.multi_reduction <maximumf>, %2, %cst_5 [2] : vector<4x16x16xf32> to vector<4x16xf32>
    %cst_6 = arith.constant dense<0.000000e+00> : vector<4x16xf32>
    %4 = vector.multi_reduction <add>, %2, %cst_6 [2] : vector<4x16x16xf32> to vector<4x16xf32>
    %cst_7 = arith.constant 6.250000e-02 : f32
    %5 = vector.broadcast %cst_7 : f32 to vector<4x16xf32>
    %6 = arith.mulf %4, %5 : vector<4x16xf32>
    %7 = arith.subf %3, %6 : vector<4x16xf32>
    %c0_8 = arith.constant 0 : index
    %c0_9 = arith.constant 0 : index
    %c0_10 = arith.constant 0 : index
    %8 = vector.load %arg4[%c0_8, %c0_9, %c0_10] : memref<1x4x16xf32, #tpu.memory_space<vmem>>, vector<1x4x16xf32>
    %9 = vector.shape_cast %8 : vector<1x4x16xf32> to vector<4x16xf32>
    %10 = vector.shape_cast %7 : vector<4x16xf32> to vector<1x4x16xf32>
    tpu.vector_store %arg4[%c0_8, %c0_9, %c0_10], %10 {strides = array<i32>} : memref<1x4x16xf32, #tpu.memory_space<vmem>>, vector<1x4x16xf32>,
    return
  }
  func.func @transform_0(%arg0: i32, %arg1: i32) -> (i32, i32, i32) {
    %c1_i32 = arith.constant 1 : i32
    %0 = arith.muli %arg0, %c1_i32 : i32
    %1 = arith.addi %0, %arg1 : i32
    %c0_i32 = arith.constant 0 : i32
    %c0_i32_0 = arith.constant 0 : i32
    %c0_i32_1 = arith.constant 0 : i32
    return %1, %c0_i32, %c0_i32_0 : i32, i32, i32
  }
  func.func @transform_1(%arg0: i32, %arg1: i32) -> (i32, i32, i32) {
    %c1_i32 = arith.constant 1 : i32
    %0 = arith.muli %arg0, %c1_i32 : i32
    %1 = arith.addi %0, %arg1 : i32
    %c0_i32 = arith.constant 0 : i32
    %c0_i32_0 = arith.constant 0 : i32
    %c0_i32_1 = arith.constant 0 : i32
    return %1, %c0_i32, %c0_i32_0 : i32, i32, i32
  }
  func.func @transform_2(%arg0: i32, %arg1: i32) -> (i32, i32, i32) {
    %c1_i32 = arith.constant 1 : i32
    %0 = arith.muli %arg0, %c1_i32 : i32
    %1 = arith.addi %0, %arg1 : i32
    %c0_i32 = arith.constant 0 : i32
    %c0_i32_0 = arith.constant 0 : i32
    %c0_i32_1 = arith.constant 0 : i32
    return %1, %c0_i32, %c0_i32_0 : i32, i32, i32
  }
}

</mosaic_0001>

<bundles_post_ra>
// kernel: tpu_custom_call.1
= control target key start
LH: loop header
LB: loop body
LE: loop exit
PB: predicated region body
PF: predicated region fallthrough
CT: control target
= control target key end

     0   :  { %7 = vsyncpa [#allocation3], 0  ;;  %s1306_s0 = inlined_call_operand.hbm [shape: bf16[8,16,32], index: 0, kind: input, shape index: {}]   ;;  %s1307_s1 = inlined_call_operand.hbm [shape: bf16[8,16,32], index: 1, kind: input, shape index: {}]   ;;  %s1308_s2 = inlined_call_operand.hbm [shape: f32[2,4,16], index: 2, kind: output, shape index: {}]  }
   0x1   :  { %9 = vsyncpa [#allocation3 + $0x1], 0 }
   0x2   :  { %10 = vsyncpa [#allocation6], 0 }
   0x3   :  { %12 = vsyncpa [#allocation6 + $0x1], 0 }
   0x4   :  { %13 = vsyncpa [#allocation4], 0 }
   0x5   :  { %15 = vsyncpa [#allocation4 + $0x1], 0  ;;  %s1033_s9 = smov 0   ;;  %s1035_s10 = smov 0  }
   0x6   :  { %s1037_s11 = smov 0   ;;  %s1039_s12 = smov 0  }
   0x7   :  { %s1041_s13 = smov 0   ;;  %s1043_s14 = smov 0  }
   0x8 LB: > { %s716_s15 = sadd.s32 4294967295, %s1009_s14   ;;  %s717_s16 = sadd.s32 4294967294, %s1009_s14   ;;  %s1009_s14 = sphi %s1043_s14, %s21_s14   ;;  %s1005_s13 = sphi %s1041_s13, %s1326_s13   ;;  %s1001_s12 = sphi %s1039_s12, %s1325_s12   ;;  %s997_s11 = sphi %s1037_s11, %s1324_s11   ;;  %s993_s10 = sphi %s1035_s10, %s1323_s10   ;;  %s989_s9 = sphi %s1033_s9, %s1322_s9  }
   0x9   : > { %s33_s17 = sadd.s32 1, %s1005_s13  ;;  %s42_s18 = sadd.s32 1, %s997_s11 }
   0xa   : > { %p35_p0 = scmp.ge.s32.totalorder %s33_s17, 2  ;;  %p49_p1 = scmp.ne.s32.totalorder %s997_s11, %s993_s10 }
   0xb   : > { %p50_p2 = scmp.eq.s32.totalorder %s1009_s14, 0  ;;  %p55_p3 = scmp.ne.s32.totalorder %s993_s10, %s989_s9 }
   0xc   : > { %s1328_s17 = smov (%p35_p0, %s33_s17), 0  ;;  %p56_p5 = scmp.eq.s32.totalorder %s716_s15, 0 }
   0xd   : > { %p1074_p4 = por %p50_p2, %p49_p1  ;;  %s39_s20 = ssub.s32 %s1005_s13, %s1328_s17 }
   0xe   : > { %p109_p6 = scmp.eq.s32.totalorder %s716_s15, 1  ;;  %p40_p7 = scmp.eq.s32.totalorder %s39_s20, 0 }
   0xf   : > { %p1080_p8 = por %p56_p5, %p55_p3  ;;  %p115_p10 = scmp.eq.s32.totalorder %s717_s16, 1 }
  0x10   : > { %p1084_p9 = por %p109_p6, %p49_p1  ;;  %p801_p13 = scmp.lt.s32.totalorder %s1009_s14, 2 }
  0x11   : > { %s1312_s21 = scalar_select %p1080_p8, 1, 0 }
  0x12   : > { %s1313_s22 = scalar_select %p1084_p9, 1, 0 }
  0x13   : > { %s1089_s23 = scalar_select %p40_p7, %s997_s11, %s42_s18  }
  0x14   : > { %p1091_p11 = por %p115_p10, %p55_p3  ;;  %s1098_s25 = sand.u32 1, %s997_s11  }
  0x15   : > { %s720_s26 = sshll.u32 %s1098_s25, 5  ;;  %s749_s27 = sshll.u32 %s1005_s13, 9 }
  0x16   : > { %s1314_s24 = scalar_select %p1091_p11, 1, 0 }
  0x17   : > { %s1107_s30 = scalar_lea.hbm %s1306_s0, %s749_s27  ;;  %s139_s3 = scalar_lea.vmem [#allocation2], %s720_s26 }
  0x18   : > { %s148_s4 = sshll.u32 %s139_s3, 4  ;;  %p1115_p0 = pnand %p801_p13, %p1074_p4  ;;  %s1111_s4 = int_to_ptr.vmem [resolvable:$true] %s148_s4 }
  0x19   : > { %s136_s6 = scalar_lea.sflag [#allocation3], %s1098_s25  ;;  %s863_s7 = scalar_lea.hbm %s1107_s30, 512 }
  0x1a   : > { %p864_p2 = scmp.ne.s32.totalorder %s1107_s30, %s863_s7  ;;  %p865_p3 = pneg %p1115_p0 }
  0x1b   : > { %s868_s16 = scalar_lea.hbm %s1306_s0, 1024  ;;  %p869_p4 = scmp.lt.u32.totalorder %s1107_s30, %s1306_s0 }
  0x1c   : > { %p866_p5 = pnand %p865_p3, %p864_p2  ;;  %p870_p7 = scmp.lt.u32.totalorder %s868_s16, %s863_s7 }
  0x1d   : > { %p872_p13 = scmp.lt.u32.totalorder %s863_s7, %s1107_s30 }
  0x1e   : > { %p867_p6 = pneg %p866_p5  ;;  %p871_p10 = por %p870_p7, %p869_p4 }
  0x20   : > { %p873_p12 = por %p872_p13, %p871_p10 }
  0x22   : > { %p874_p1 = pnand %p873_p12, %p867_p6 }
  0x24   : > { %877 = shalt.err (!%p874_p1)
}
  0x25   : > { %s878_s20 = scalar_lea.vmem %s1111_s4, 512  ;;  %s1011_s28 = smov [#allocation2]  }
  0x26   : > { %p879_p2 = scmp.ne.s32.totalorder %s1111_s4, %s878_s20  ;;  %s883_s29 = sshll.u32 %s1011_s28, 4  ;;  %s884_s29 = int_to_ptr.vmem [resolvable:$false] %s883_s29 }
  0x27   : > { %s885_s3 = scalar_lea.vmem %s884_s29, 1024  ;;  %p886_p9 = scmp.lt.s32.totalorder %s1111_s4, %s884_s29 }
  0x28   : > { %p881_p5 = pnand %p879_p2, %p865_p3  ;;  %p887_p4 = scmp.lt.s32.totalorder %s885_s3, %s878_s20 }
  0x2a   : > { %p882_p11 = pneg %p881_p5  ;;  %p888_p7 = por %p887_p4, %p886_p9 }
  0x2c   : > { %p889_p10 = pnand %p888_p7, %p882_p11 }
  0x2e   : > { %892 = shalt.err (!%p889_p10)
}
  0x2f   : > { %s1012_s7 = smov 64   ;;  %s1013_s8 = smov 4  }
  0x30   : > { %793 = dma.hbm_to_vmem [thread:$0]  (!%p1115_p0), %s1107_s30, 512, %s1111_s4, %s136_s6, %s1012_s7, %s1012_s7, %s1013_s8  }
  0x31   : > { %p179_p9 = scmp.lt.s32.totalorder %s1009_s14, 3  ;;  %s1157_s18 = scalar_lea.hbm %s1307_s1, %s749_s27 }
  0x32   : > { %p1316_p11 = scmp.ge.s32.totalorder %s1009_s14, 1  ;;  %s162_s20 = scalar_lea.vmem [#allocation5], %s720_s26 }
  0x33   : > { %s171_s28 = sshll.u32 %s162_s20, 4  ;;  %s159_s30 = scalar_lea.sflag [#allocation6], %s1098_s25  ;;  %s1167_s28 = int_to_ptr.vmem [resolvable:$true] %s171_s28 }
  0x34   : > { %p1161_p12 = pnand %p1316_p11, %p179_p9  ;;  %s893_s4 = scalar_lea.hbm %s1157_s18, 512 }
  0x35   : > { %p894_p1 = scmp.ne.s32.totalorder %s1157_s18, %s893_s4  ;;  %s898_s29 = scalar_lea.hbm %s1307_s1, 1024 }
  0x36   : > { %p899_p2 = scmp.lt.u32.totalorder %s1157_s18, %s1307_s1  ;;  %p900_p5 = scmp.lt.u32.totalorder %s898_s29, %s893_s4 }
  0x37   : > { %p896_p6 = pnand %p894_p1, %p865_p3  ;;  %p902_p7 = scmp.lt.u32.totalorder %s893_s4, %s1157_s18 }
  0x38   : > { %p901_p4 = por %p900_p5, %p899_p2 }
  0x39   : > { %p897_p13 = pneg %p896_p6 }
  0x3a   : > { %p903_p10 = por %p902_p7, %p901_p4 }
  0x3c   : > { %p904_p9 = pnand %p903_p10, %p897_p13 }
  0x3e   : > { %907 = shalt.err (!%p904_p9)
}
  0x3f   : > { %s908_s26 = scalar_lea.vmem %s1167_s28, 512  ;;  %s1014_s16 = smov [#allocation5]  }
  0x40   : > { %p909_p11 = scmp.ne.s32.totalorder %s1167_s28, %s908_s26  ;;  %s913_s20 = sshll.u32 %s1014_s16, 4  ;;  %s914_s20 = int_to_ptr.vmem [resolvable:$false] %s913_s20 }
  0x41   : > { %s915_s27 = scalar_lea.vmem %s914_s20, 1024  ;;  %p916_p8 = scmp.lt.s32.totalorder %s1167_s28, %s914_s20 }
  0x42   : > { %p911_p1 = pnand %p909_p11, %p865_p3  ;;  %p917_p2 = scmp.lt.s32.totalorder %s915_s27, %s908_s26 }
  0x44   : > { %p912_p6 = pneg %p911_p1  ;;  %p918_p5 = por %p917_p2, %p916_p8 }
  0x46   : > { %p919_p4 = pnand %p918_p5, %p912_p6 }
  0x48   : > { %922 = shalt.err (!%p919_p4)
}
  0x49   : > { %796 = dma.hbm_to_vmem [thread:$0]  (!%p1115_p0), %s1157_s18, 512, %s1167_s28, %s159_s30, %s1012_s7, %s1012_s7, %s1013_s8  }
  0x4a   : > { %183 = sbr.rel (%p1161_p12) target bundleno = 497 (0x1f1), region = 28  ;;  %s1201_s4 = sand.u32 (!%p1161_p12), 1, %s993_s10  }
  0x4b   : > { %s729_s6 = sshll.u32 (!%p1161_p12), %s1201_s4, 5  ;;  %s186_s29 = scalar_lea.sflag (!%p1161_p12), [#allocation3], %s1201_s4 }
  0x4c   : > { %s1205_s5 = scalar_lea.vmem (!%p1161_p12), [#allocation2], %s729_s6  ;;  %p1318_p8 = scmp.ne.s32.totalorder (!%p1161_p12), %s1312_s21, 0 }
  0x51   : > { %976 = dma.done.wait (%p1318_p8), %s186_s29, 512  }
  0x52   : > { %978 = vsyncadd (%p1318_p8), %s186_s29, 4294966784  ;;  %s195_s25 = scalar_lea.sflag [#allocation6], %s1201_s4  ;;  %s198_s7 = scalar_lea.vmem [#allocation5], %s729_s6 }
  0x53   : > { %980 = dma.done.wait (%p1318_p8), %s195_s25, 512  }
  0x54   : > { %982 = vsyncadd (%p1318_p8), %s195_s25, 4294966784  ;;  %v1015_v0 = vmov 0.0   ;;  %vm1016_vm0 = vmmov 0   ;;  %vm256_vm1 = vcmask 261120   ;;  %v855_v1 = vld [vmem:[%s198_s7] sm:$0xff]   ;;  %v856_v2 = vld [vmem:[%s198_s7 + $0x8] sm:$0xff]   ;;  %v548_v52 = vlaneseq }
  0x55   : > { %760 = vmatprep.subr.bf16.mxu0 %v1015_v0  ;;  %766 = vmatprep.subr.bf16.mxu1 %v1015_v0  ;;  %v261_v3 = vsel %vm256_vm1, %v855_v1, 0  ;;  %v318_v4 = vsel %vm256_vm1, %v856_v2, 0  ;;  %v859_v5 = vld [vmem:[%s198_s7 + $0x10] sm:$0xff]   ;;  %v860_v6 = vld [vmem:[%s198_s7 + $0x18] sm:$0xff]   ;;  %v857_v7 = vld [vmem:[%s1205_s5] sm:$0xff]   ;;  %vm475_vm2 = vcmask 130048  }
  0x56   : > { %762 = vmatprep.mubr.msk.bf16.mxu0 %vm1016_vm0, %v1015_v0  ;;  %768 = vmatprep.mubr.msk.bf16.mxu1 %vm1016_vm0, %v1015_v0  ;;  %v858_v8 = vld [vmem:[%s1205_s5 + $0x8] sm:$0xff]   ;;  %v375_v9 = vsel %vm256_vm1, %v859_v5, 0  ;;  %v432_v10 = vsel %vm256_vm1, %v860_v6, 0  ;;  %v861_v11 = vld [vmem:[%s1205_s5 + $0x10] sm:$0xff]   ;;  %v862_v12 = vld [vmem:[%s1205_s5 + $0x18] sm:$0xff]   ;;  %v549_v55 = vand.u32 127, %v548_v52 }
  0x57   : > { %761 = vmatpush3.bf16.xpose.msra.mxu0 %v261_v3  ;;  %767 = vmatpush3.bf16.xpose.msra.mxu1 %v318_v4  ;;  %v551_v58 = vshrl.u32 %v548_v52, 7  ;;  %s731_s21 = sshll.u32 %s1201_s4, 2  ;;  %vm559_vm3 = vcmask 130112   ;;  %vm588_vm4 = vcmask 1041409   ;;  %vm590_vm5 = vcmask 1042434   ;;  %s745_s8 = sshll.u32 %s1001_s12, 6 }
  0x58   : > { %772 = vmatprep.subr.bf16.mxu0 %v1015_v0  ;;  %778 = vmatprep.subr.bf16.mxu1 %v1015_v0  ;;  %v554_v59 = vadd.s32 4294967288, %v549_v55  ;;  %s223_s18 = scalar_lea.vmem [#allocation7], %s731_s21  ;;  %vm592_vm6 = vcmask 1043459   ;;  %vm595_vm7 = vcmask 125952   ;;  %s1257_s3 = scalar_lea.hbm %s1308_s2, %s745_s8 }
  0x59   : > { %v552_v1 = vsub.s32 %v549_v55, %v551_v58  ;;  %s612_s19 = sshll.u32 %s223_s18, 4  ;;  %s598_s12 = scalar_lea.sflag [#allocation4], %s1201_s4  ;;  %s1259_s19 = int_to_ptr.vmem [resolvable:$true] %s612_s19 }
  0x5a   : > { %v557_v2 = vsub.s32 %v554_v59, %v551_v58  ;;  %s923_s15 = scalar_lea.vmem %s1259_s19, 64  ;;  %p1319_p3 = scmp.ne.s32.totalorder %s1313_s22, 0 }
  0x5b   : > { %p924_p0 = scmp.ne.s32.totalorder %s1259_s19, %s923_s15  ;;  %s1017_s26 = smov [#allocation7]  }
  0x5c   : > { %s927_s16 = sshll.u32 %s1017_s26, 4  ;;  %s928_s16 = int_to_ptr.vmem [resolvable:$false] %s927_s16 }
  0x5d   : > { %p925_p12 = pnand %p924_p0, %p1319_p3  ;;  %s929_s20 = scalar_lea.vmem %s928_s16, 128 }
  0x5e   : > { %763 = vmatmul.mubr.msk.bf16.vlgmr.msra.gmra.mrb[0].mxu0 %vm256_vm1, %v857_v7  ;;  %769 = vmatmul.mubr.msk.bf16.vlgmr.msra.gmra.mrb[0].mxu1 %vm256_vm1, %v858_v8  ;;  %p930_p7 = scmp.lt.s32.totalorder %s1259_s19, %s928_s16  ;;  %p931_p10 = scmp.lt.s32.totalorder %s929_s20, %s923_s15 }
  0x5f   : > { %773 = vmatpush3.bf16.xpose.msra.mxu0 %v375_v9  ;;  %779 = vmatpush3.bf16.xpose.msra.mxu1 %v432_v10  ;;  %p926_p13 = pneg %p925_p12 }
  0x60   : > { %774 = vmatprep.mubr.msk.bf16.mxu0 %vm1016_vm0, %v1015_v0  ;;  %780 = vmatprep.mubr.msk.bf16.mxu1 %vm1016_vm0, %v1015_v0  ;;  %p932_p9 = por %p931_p10, %p930_p7 }
  0x62   : > { %p933_p11 = pnand %p932_p9, %p926_p13 }
  0x66   : > { %775 = vmatmul.mubr.msk.bf16.vlgmr.msra.gmra.mrb[4].mxu0 %vm256_vm1, %v861_v11  ;;  %781 = vmatmul.mubr.msk.bf16.vlgmr.msra.gmra.mrb[4].mxu1 %vm256_vm1, %v862_v12 }
 0x131   : > { %v297_v13 = vpop.f32.mrb[0].mxu0  ;;  %v354_v14 = vpop.f32.mrb[0].mxu1 }
 0x132   : > { %v764_v15 = vpop.f32.mrb[1].mxu0  ;;  %v500_v16 = vsel %vm475_vm2, %v297_v13, 0.0  ;;  %v770_v17 = vpop.f32.mrb[1].mxu1  ;;  %v506_v18 = vsel %vm475_vm2, %v354_v14, 0.0  ;;  %v476_v23 = vsel %vm475_vm2, %v297_v13, -inf  ;;  %v482_v26 = vsel %vm475_vm2, %v354_v14, -inf }
 0x133   : > { %501 = vadd.xlane.f32.xlu0 %v500_v16  ;;  %v300_v19 = vpop.f32.mrb[2].mxu0  ;;  %507 = vadd.xlane.f32.xlu1 %v506_v18  ;;  %v357_v20 = vpop.f32.mrb[2].mxu1 }
 0x134   : > { %v765_v21 = vpop.f32.mrb[3].mxu0  ;;  %v771_v22 = vpop.f32.mrb[3].mxu1  ;;  %v509_v24 = vsel %vm475_vm2, %v357_v20, 0.0  ;;  %v479_v29 = vsel %vm475_vm2, %v300_v19, -inf  ;;  %v503_v35 = vsel %vm475_vm2, %v300_v19, 0.0  ;;  %v485_v36 = vsel %vm475_vm2, %v357_v20, -inf }
 0x137   : > { %477 = vmax.xlane.f32.xlu0 %v476_v23  ;;  %510 = vadd.xlane.f32.xlu1 %v509_v24 }
 0x139   : > { %v411_v25 = vpop.f32.mrb[4].mxu0  ;;  %v468_v28 = vpop.f32.mrb[4].mxu1 }
 0x13a   : > { %v776_v27 = vpop.f32.mrb[5].mxu0  ;;  %v782_v31 = vpop.f32.mrb[5].mxu1  ;;  %v512_v37 = vsel %vm475_vm2, %v411_v25, 0.0  ;;  %v518_v39 = vsel %vm475_vm2, %v468_v28, 0.0  ;;  %v488_v41 = vsel %vm475_vm2, %v411_v25, -inf  ;;  %v494_v43 = vsel %vm475_vm2, %v468_v28, -inf }
 0x13b   : > { %483 = vmax.xlane.f32.xlu0 %v482_v26  ;;  %v414_v30 = vpop.f32.mrb[6].mxu0  ;;  %480 = vmax.xlane.f32.xlu1 %v479_v29  ;;  %v471_v33 = vpop.f32.mrb[6].mxu1 }
 0x13c   : > { %v777_v32 = vpop.f32.mrb[7].mxu0  ;;  %v783_v34 = vpop.f32.mrb[7].mxu1  ;;  %v515_v38 = vsel %vm475_vm2, %v414_v30, 0.0  ;;  %v521_v40 = vsel %vm475_vm2, %v471_v33, 0.0  ;;  %v491_v42 = vsel %vm475_vm2, %v414_v30, -inf  ;;  %v497_v44 = vsel %vm475_vm2, %v471_v33, -inf }
 0x13f   : > { %504 = vadd.xlane.f32.xlu0 %v503_v35  ;;  %486 = vmax.xlane.f32.xlu1 %v485_v36 }
 0x143   : > { %513 = vadd.xlane.f32.xlu0 %v512_v37  ;;  %516 = vadd.xlane.f32.xlu1 %v515_v38 }
 0x147   : > { %519 = vadd.xlane.f32.xlu0 %v518_v39  ;;  %522 = vadd.xlane.f32.xlu1 %v521_v40 }
 0x14b   : > { %489 = vmax.xlane.f32.xlu0 %v488_v41  ;;  %492 = vmax.xlane.f32.xlu1 %v491_v42 }
 0x14f   : > { %495 = vmax.xlane.f32.xlu0 %v494_v43  ;;  %498 = vmax.xlane.f32.xlu1 %v497_v44 }
 0x1c0   : > { %v502_v45 = vpop.xlane.xlu0 %501  ;;  %v508_v46 = vpop.xlane.xlu1 %507 }
 0x1c1   : > { %v524_v62 = vmul.f32 0.0625, %v502_v45  ;;  %v526_v4 = vmul.f32 0.0625, %v508_v46 }
 0x1c4   : > { %v478_v47 = vpop.xlane.xlu0 %477  ;;  %v511_v48 = vpop.xlane.xlu1 %510 }
 0x1c5   : > { %v527_v63 = vmul.f32 0.0625, %v511_v48  ;;  %v532_v5 = vsub.f32 %v478_v47, %v524_v62 }
 0x1c7   : > { %v553_v16 = vrot.slane %v532_v5, %v552_v1 }
 0x1c8   : > { %v484_v49 = vpop.xlane.xlu0 %483  ;;  %v481_v50 = vpop.xlane.xlu1 %480 }
 0x1c9   : > { %v534_v11 = vsub.f32 %v484_v49, %v526_v4 }
 0x1cb   : > { %v564_v23 = vrot.slane %v534_v11, %v552_v1 }
 0x1cc   : > { %v505_v51 = vpop.xlane.xlu0 %504  ;;  %v487_v53 = vpop.xlane.xlu1 %486 }
 0x1cd   : > { %v525_v57 = vmul.f32 0.0625, %v505_v51  ;;  %v535_v6 = vsub.f32 %v487_v53, %v527_v63 }
 0x1cf   : > { %v533_v0 = vsub.f32 %v481_v50, %v525_v57  ;;  %v568_v17 = vrot.slane %v535_v6, %v557_v2 }
 0x1d0   : > { %v514_v54 = vpop.xlane.xlu0 %513  ;;  %v517_v56 = vpop.xlane.xlu1 %516 }
 0x1d1   : > { %v528_v3 = vmul.f32 0.0625, %v514_v54  ;;  %v529_v7 = vmul.f32 0.0625, %v517_v56  ;;  %v558_v12 = vrot.slane %v533_v0, %v557_v2  ;;  %v569_v28 = vsel %vm559_vm3, %v568_v17, %v564_v23 }
 0x1d3   : > { %v560_v24 = vsel %vm559_vm3, %v558_v12, %v553_v16 }
 0x1d4   : > { %v520_v60 = vpop.xlane.xlu0 %519  ;;  %v523_v61 = vpop.xlane.xlu1 %522  ;;  %v589_v30 = vsel %vm588_vm4, %v569_v28, %v560_v24 }
 0x1d5   : > { %v530_v14 = vmul.f32 0.0625, %v520_v60  ;;  %v531_v18 = vmul.f32 0.0625, %v523_v61 }
 0x1d8   : > { %v490_v8 = vpop.xlane.xlu0 %489  ;;  %v493_v10 = vpop.xlane.xlu1 %492 }
 0x1d9   : > { %v536_v9 = vsub.f32 %v490_v8, %v528_v3  ;;  %v537_v13 = vsub.f32 %v493_v10, %v529_v7 }
 0x1db   : > { %v573_v15 = vrot.slane %v536_v9, %v552_v1  ;;  %v577_v19 = vrot.slane %v537_v13, %v557_v2 }
 0x1dc   : > { %v496_v20 = vpop.xlane.xlu0 %495  ;;  %v499_v22 = vpop.xlane.xlu1 %498 }
 0x1dd   : > { %v538_v21 = vsub.f32 %v496_v20, %v530_v14  ;;  %v539_v25 = vsub.f32 %v499_v22, %v531_v18  ;;  %v578_v26 = vsel %vm559_vm3, %v577_v19, %v573_v15 }
 0x1de   : > { %v591_v31 = vsel %vm590_vm5, %v578_v26, %v589_v30 }
 0x1df   : > { %v582_v27 = vrot.slane %v538_v21, %v552_v1  ;;  %v586_v29 = vrot.slane %v539_v25, %v557_v2 }
 0x1e1   : > { %v587_v32 = vsel %vm559_vm3, %v586_v29, %v582_v27 }
 0x1e2   : > { %v593_v33 = vsel %vm592_vm6, %v587_v32, %v591_v31 }
 0x1e3   : > { %596 = vst.msk [vmem:[%s223_s18] sm:$0xf] %vm595_vm7, %v593_v33 }
 0x1e4   : > { %936 = shalt.err (!%p933_p11)
}
 0x1e5   : > { %s937_s27 = scalar_lea.hbm %s1257_s3, 64  ;;  %s941_s29 = scalar_lea.hbm %s1308_s2, 128 }
 0x1e6   : > { %p938_p1 = scmp.ne.s32.totalorder %s1257_s3, %s937_s27  ;;  %p942_p5 = scmp.lt.u32.totalorder %s1257_s3, %s1308_s2 }
 0x1e7   : > { %p943_p4 = scmp.lt.u32.totalorder %s941_s29, %s937_s27  ;;  %p945_p0 = scmp.lt.u32.totalorder %s937_s27, %s1257_s3 }
 0x1e8   : > { %p939_p6 = pnand %p938_p1, %p1319_p3 }
 0x1e9   : > { %p944_p8 = por %p943_p4, %p942_p5 }
 0x1ea   : > { %p940_p2 = pneg %p939_p6 }
 0x1eb   : > { %p946_p12 = por %p945_p0, %p944_p8 }
 0x1ed   : > { %p947_p13 = pnand %p946_p12, %p940_p2 }
 0x1ef   : > { %950 = shalt.err (!%p947_p13)
}
 0x1f0   : > { %788 = dma.vmem_to_hbm [thread:$0]  (%p1319_p3), %s1259_s19, 64, %s1257_s3, %s598_s12  }
 0x1f1 PF: > { %s624_s7 = sand.u32 1, %s989_s9   ;;  %p1320_p7 = scmp.ne.s32.totalorder %s1314_s24, 0 }
 0x1f2   : > { %p1321_p10 = scmp.ge.s32.totalorder %s1009_s14, 2  ;;  %s625_s21 = scalar_lea.sflag [#allocation4], %s624_s7 }
 0x1f4   : > { %p798_p9 = pnand %p1321_p10, %p1320_p7 }
 0x1f6   : > { %984 = dma.done.wait (!%p798_p9), %s625_s21, 64  }
 0x1f7   : > { %986 = vsyncadd (!%p798_p9), %s625_s21, 4294967232  ;;  %s21_s14 = sadd.s32 1, %s1009_s14   ;;  %s1322_s9 = smov %s993_s10 }
 0x1f8   : > { %p18_p11 = scmp.ge.s32.totalorder %s21_s14, 4   ;;  %s1323_s10 = smov %s997_s11 }
 0x1f9   : > { %s1324_s11 = smov %s1089_s23  ;;  %s1325_s12 = smov %s1005_s13 }
 0x1fa   : > { %s1326_s13 = smov %s1328_s17  ;;  %20 = sbr.rel (!%p18_p11) target bundleno = 8 (0x8), region = 86 }
 0x201   :  { %630 = vsyncpa [#allocation3], 1 }
 0x202   :  { %632 = vsyncpa [#allocation3 + $0x1], 1 }
 0x203   :  { %633 = vsyncpa [#allocation6], 1 }
 0x204   :  { %635 = vsyncpa [#allocation6 + $0x1], 1 }
 0x205   :  { %636 = vsyncpa [#allocation4], 1 }
 0x206   :  { %638 = vsyncpa [#allocation4 + $0x1], 1 }

</bundles_post_ra>
